<compile_context>
chip_gen: v5e
topology: v5e:2x2
jax: 0.10.0
libtpu: 0.0.40
codegen_flags: <defaults>
</compile_context>

<pallas_src>
import jax
import jax.numpy as jnp
from jax.experimental import pallas as pl
from jax.experimental.pallas import tpu as pltpu


def _round_up(x, m):
    return ((x + m - 1) // m) * m


_VMEM_BUDGET = None


def _vmem_budget_bytes():
    """~75% of per-core VMEM: 48 MiB on v7x (64 MiB), 96 MiB on v5e/v6e (128 MiB)."""
    global _VMEM_BUDGET
    if _VMEM_BUDGET is None:
        cap = None
        try:
            cap = getattr(pltpu.get_tpu_info(), "vmem_capacity_bytes", None)
        except Exception:
            cap = None
        if not cap:
            cap = 64 * 1024 * 1024          # conservative fallback (v7x-sized)
        _VMEM_BUDGET = (int(cap) * 3) // 4
    return _VMEM_BUDGET


# ----------------------------------------------------------------------------
# STFT kernel:  spec = frames @ (window-folded, real/imag-interleaved DFT)
# The signal is tiled per frame-tile with a +ratio-1 row halo; frame t is the
# concatenation of rows t..t+ratio-1 of `seg` samples, so the matmul is done as
# `ratio` K=seg partial matmuls (no in-kernel concatenate).
# ----------------------------------------------------------------------------
def _make_stft_kernel(TF, ratio, seg, F2pad):
    def kernel(sig_ref, dft_ref, o_ref):
        acc = jnp.zeros((TF, F2pad), jnp.float32)
        for r in range(ratio):
            part = sig_ref[0, 0, pl.ds(r, TF), :]                  # (TF, seg)
            acc = acc + jnp.dot(part, dft_ref[pl.ds(r * seg, seg), :],
                                preferred_element_type=jnp.float32)
        o_ref[0] = acc
    return kernel


def stft_pallas(xw, dft_w, n_fft, hop):
    """xw: [B, time] f32.  dft_w: [n_fft, F2pad] (Hann window + 1/norm folded in,
    real/imag interleaved).  Returns [B, T, F2pad]; caller drops lane padding."""
    B, time = xw.shape
    assert time >= n_fft, "input shorter than n_fft (torch.stft would error)"
    F2pad = dft_w.shape[1]
    T = (time - n_fft) // hop + 1
    TF = min(256, _round_up(T, 8))          # frames per grid step
    T_pad = _round_up(T, TF)
    n_tiles = T_pad // TF

    if n_fft % hop == 0:
        ratio, seg = n_fft // hop, hop
        rows = T_pad + ratio - 1
        need = rows * seg
        sig = xw[:, :min(time, need)]
        sig = jnp.pad(sig, ((0, 0), (0, need - sig.shape[1])))
        sig2d = sig.reshape(B, rows, seg)
    else:
        # TODO(synk): when hop does not divide n_fft, frames are materialized on
        # the host (extra HBM traffic); in-kernel framing covers the common case.
        ratio, seg = 1, n_fft
        rows = T_pad
        idx = jnp.arange(T_pad)[:, None] * hop + jnp.arange(n_fft)[None, :]
        sig2d = xw[:, jnp.minimum(idx, time - 1)]

    # Per-tile signal block with a +ratio-1 halo -> VMEM bounded for long clips.
    halo = TF + ratio - 1
    tidx = jnp.arange(n_tiles)[:, None] * TF + jnp.arange(halo)[None, :]
    sig3d = sig2d[:, tidx]                                 # [B, n_tiles, halo, seg]

    budget = _vmem_budget_bytes()
    est = 2 * (halo * seg * 4 + n_fft * F2pad * 4 + TF * F2pad * 4)
    vmem_limit = int(min(budget, max(2 * est, 32 * 1024 * 1024)))
    # TODO(synk): the constant-index DFT block is still double-buffered; for very
    # large n_fft, tile its column axis into the grid (or pl.Buffered(1)).

    out = pl.pallas_call(
        _make_stft_kernel(TF, ratio, seg, F2pad),
        out_shape=jax.ShapeDtypeStruct((B, T_pad, F2pad), jnp.float32),
        grid=(B, n_tiles),
        in_specs=[
            pl.BlockSpec((1, 1, halo, seg), lambda b, m: (b, m, 0, 0)),
            # constant-index block: DMA'd once, reused across the whole grid
            pl.BlockSpec((n_fft, F2pad), lambda b, m: (0, 0)),
        ],
        out_specs=pl.BlockSpec((1, TF, F2pad), lambda b, m: (b, m, 0)),
        compiler_params=pltpu.CompilerParams(
            dimension_semantics=("parallel", "parallel"),
            vmem_limit_bytes=vmem_limit),
    )(sig3d, dft_w)
    return out[:, :T, :]


# ----------------------------------------------------------------------------
# Conv2d (+ bias + optional LeakyReLU) kernel.
#
# Host-side layout: the (spatially padded) bf16 input is phase-split over the
# width stride, time-tiled with a halo of R = (KH-1)*dh rows, and flattened so
# that for every tap (kh, kw) the data needed for a whole TH x Wo output tile is
# a single contiguous (TH*L, Cin_tile) slab at a *static* offset.
#
# Grid = (B, n_h_tiles, n_cout_tiles, n_cin_tiles); the Cin axis is the reduction
# (last, "arbitrary") with a VMEM f32 accumulator written once per ci step; bias
# + LeakyReLU are fused into the finalize step.
# ----------------------------------------------------------------------------
def _make_conv_kernel(KH, KW, sw, dh, L, TH, FLAT, n_ci, apply_act,
                      neg_slope, use_scratch):
    MROWS = TH * L

    def tap_chain(x_ref, w_ref):
        acc = None
        for kh in range(KH):
            for kw in range(KW):
                p, base = kw % sw, kw // sw
                off = p * FLAT + kh * dh * L + base            # static python int
                slab = x_ref[0, 0, pl.ds(off, MROWS), :]       # (MROWS, TCI) bf16
                d = jnp.dot(slab, w_ref[kh, kw],
                            preferred_element_type=jnp.float32)
                acc = d if acc is None else acc + d
        return acc

    def finalize(acc, b_ref, o_ref):
        r = acc + b_ref[...]                                   # (1, TCO) broadcast
        if apply_act:
            r = jnp.where(r >= 0, r, neg_slope * r)
        o_ref[0, 0] = r.astype(o_ref.dtype)

    if not use_scratch:        # single Cin tile: no cross-step accumulation needed
        def kernel(x_ref, w_ref, b_ref, o_ref):
            finalize(tap_chain(x_ref, w_ref), b_ref, o_ref)
        return kernel

    def kernel(x_ref, w_ref, b_ref, o_ref, acc_ref):
        ci = pl.program_id(3)
        acc = tap_chain(x_ref, w_ref)

        @pl.when(ci == 0)
        def _first():
            acc_ref[...] = acc          # store only (no zero-init + extra add)

        @pl.when(ci > 0)
        def _accum():
            acc_ref[...] += acc

        @pl.when(ci == n_ci - 1)
        def _fin():
            finalize(acc_ref[...], b_ref, o_ref)

    return kernel


def conv2d_lrelu(x, w, b, *, stride, dilation, padding, apply_act,
                 neg_slope=0.2, compute_dtype=jnp.bfloat16):
    """x: [B, H, W, Cin] NHWC.  w: [KH, KW, Cin, Cout].  b: [Cout].  Output f32."""
    B, H, W, Cin = x.shape
    KH, KW, _, Cout = w.shape
    sh, sw = stride
    dh, dw = dilation
    ph, pw = padding
    assert sh == 1 and dw == 1, "module only uses stride_h=1, dilation_w=1"

    # --- lane-dense output: pad tiny Cout (e.g. conv_post's 1) to 128 -----------
    Cp = Cout if Cout >= 128 else 128
    if Cp != Cout:
        w = jnp.pad(w, ((0, 0), (0, 0), (0, 0), (0, Cp - Cout)))
        b = jnp.pad(b, ((0, Cp - Cout),))

    # --- bf16 storage/compute at the kernel boundary; f32 accumulation ----------
    x = x.astype(compute_dtype)
    w = w.astype(compute_dtype)
    b32 = b.astype(jnp.float32).reshape(1, Cp)
    in_item = jnp.dtype(compute_dtype).itemsize

    xp = jnp.pad(x, ((0, 0), (ph, ph), (pw, pw), (0, 0)))
    Hp, Wp = H + 2 * ph, W + 2 * pw
    R = dh * (KH - 1)
    Ho = Hp - R
    Wo = (Wp - (KW - 1) - 1) // sw + 1

    max_base = (KW - 1) // sw
    L = max(-(-Wp // sw), Wo + max_base)

    # --- generation-aware tile selection (fills the VMEM budget) ----------------
    budget = _vmem_budget_bytes()
    fit = (budget * 85) // 100

    def vmem_est(TH_, TCO_, TCI_):
        FLAT_ = (TH_ + R) * L + max_base
        MROWS_ = TH_ * L
        xb = sw * FLAT_ * TCI_ * in_item
        wb = KH * KW * TCI_ * TCO_ * in_item
        ob = MROWS_ * TCO_ * 4
        scr = MROWS_ * TCO_ * 4 if (Cin // TCI_) > 1 else 0
        return 2 * (xb + wb + ob + TCO_ * 4) + scr

    TCI = 256 if Cin % 256 == 0 else (128 if Cin % 128 == 0 else Cin)
    tco_opts = [c for c in (512, 256, 128) if Cp % c == 0] or [Cp]
    th_opts = [t for t in (32, 16, 8) if t <= max(8, _round_up(Ho, 8))] or [8]

    if TCI == 256 and Cin % 128 == 0 and vmem_est(th_opts[-1], tco_opts[-1], TCI) > fit:
        TCI = 128                         # tight-VMEM (v7x) fallback
    TCO = next((c for c in tco_opts if vmem_est(th_opts[-1], c, TCI) <= fit),
               tco_opts[-1])
    TH = next((t for t in th_opts if vmem_est(t, TCO, TCI) <= fit), th_opts[-1])

    n_ci = Cin // TCI
    n_co = Cp // TCO
    n_ht = _round_up(Ho, TH) // TH

    # --- width phase split + flatten so every tap is one contiguous 2-D slab ----
    slots = []
    for p in range(sw):
        s = xp[:, :, p::sw, :]
        if s.shape[2] < L:
            s = jnp.pad(s, ((0, 0), (0, 0), (0, L - s.shape[2]), (0, 0)))
        slots.append(s)
    xs = jnp.stack(slots, axis=1)                          # [B, sw, Hp, L, Cin]

    Hneed = n_ht * TH + R
    if Hneed > Hp:
        xs = jnp.pad(xs, ((0, 0), (0, 0), (0, Hneed - Hp), (0, 0), (0, 0)))
    hidx = jnp.arange(n_ht)[:, None] * TH + jnp.arange(TH + R)[None, :]
    xt = xs[:, :, hidx]                                    # [B, sw, n_ht, TH+R, L, Cin]
    xt = jnp.transpose(xt, (0, 2, 1, 3, 4, 5))             # [B, n_ht, sw, TH+R, L, Cin]
    FLAT = (TH + R) * L + max_base
    xt = xt.reshape(B, n_ht, sw, (TH + R) * L, Cin)
    if max_base:
        xt = jnp.pad(xt, ((0, 0), (0, 0), (0, 0), (0, max_base), (0, 0)))
    xt = xt.reshape(B, n_ht, sw * FLAT, Cin)

    MROWS = TH * L
    use_scratch = n_ci > 1
    kernel = _make_conv_kernel(KH, KW, sw, dh, L, TH, FLAT, n_ci,
                               apply_act, neg_slope, use_scratch)

    vmem_limit = int(min(budget, max(2 * vmem_est(TH, TCO, TCI), 32 * 1024 * 1024)))
    scratch = [pltpu.VMEM((MROWS, TCO), jnp.float32)] if use_scratch else []

    out = pl.pallas_call(
        kernel,
        out_shape=jax.ShapeDtypeStruct((B, n_ht, MROWS, Cp), jnp.float32),
        grid=(B, n_ht, n_co, n_ci),
        in_specs=[
            pl.BlockSpec((1, 1, sw * FLAT, TCI), lambda b, t, co, ci: (b, t, 0, ci)),
            pl.BlockSpec((KH, KW, TCI, TCO), lambda b, t, co, ci: (0, 0, ci, co)),
            pl.BlockSpec((1, TCO), lambda b, t, co, ci: (0, co)),
        ],
        out_specs=pl.BlockSpec((1, 1, MROWS, TCO), lambda b, t, co, ci: (b, t, 0, co)),
        scratch_shapes=scratch,
        compiler_params=pltpu.CompilerParams(
            dimension_semantics=("parallel", "parallel", "parallel", "arbitrary"),
            vmem_limit_bytes=vmem_limit),
    )(xt, w, b32)

    out = out.reshape(B, n_ht, TH, L, Cp)[:, :, :, :Wo, :]
    out = out.reshape(B, n_ht * TH, Wo, Cp)[:, :Ho]
    return out[..., :Cout]


def _im2col(x, KH, KW, dil, pad, stride=(1, 1)):
    """[B,H,W,C] -> [B,Ho,Wo,KH*KW*C] (supports stride via output subsampling)."""
    B, H, W, C = x.shape
    dh, dw = dil
    ph, pw = pad
    sh, sw = stride
    xp = jnp.pad(x, ((0, 0), (ph, ph), (pw, pw), (0, 0)))
    Ho = H + 2 * ph - dh * (KH - 1)
    Wo = W + 2 * pw - dw * (KW - 1)
    cols = [xp[:, kh * dh:kh * dh + Ho, kw * dw:kw * dw + Wo, :]
            for kh in range(KH) for kw in range(KW)]
    out = jnp.concatenate(cols, axis=-1)
    return out[:, ::sh, ::sw, :]


# ----------------------------------------------------------------------------
# Model
# ----------------------------------------------------------------------------
def _hann_window_periodic(n):
    i = jnp.arange(n, dtype=jnp.float32)
    return 0.5 - 0.5 * jnp.cos(2.0 * jnp.pi * i / n)


def _pad2d(ks, dil=(1, 1)):
    return ((ks[0] - 1) * dil[0] // 2, (ks[1] - 1) * dil[1] // 2)


class DiscriminatorSTFTPallas:
    def __init__(self, filters, in_channels=1, out_channels=1, n_fft=1024,
                 hop_length=256, win_length=1024, max_filters=1024,
                 filters_scale=1, kernel_size=(3, 9), dilations=(1, 2, 4),
                 stride=(1, 2), key=None, compute_dtype=jnp.bfloat16):
        assert in_channels == 1
        assert win_length == n_fft  # TODO(synk): centered window padding when win_length < n_fft
        self.n_fft, self.hop = n_fft, hop_length
        self.compute_dtype = compute_dtype

        # STFT: periodic Hann window and 1/||win||_2 normalization folded into the
        # real DFT matrix, real/imag columns INTERLEAVED so the kernel output is
        # already (T, F, 2) NHWC; columns lane-padded to a multiple of 128.
        # The STFT matmul stays in f32 (dynamic-range / correctness).
        win = _hann_window_periodic(win_length)
        norm = jnp.sqrt(jnp.sum(win ** 2))
        fbins = n_fft // 2 + 1
        n = jnp.arange(n_fft, dtype=jnp.float32)[:, None]
        f = jnp.arange(fbins, dtype=jnp.float32)[None, :]
        ang = 2.0 * jnp.pi * n * f / n_fft
        dft = jnp.stack([jnp.cos(ang), -jnp.sin(ang)], axis=-1)   # [n_fft, fbins, 2]
        dft = dft.reshape(n_fft, 2 * fbins) * (win[:, None] / norm)
        self.fbins = fbins
        self.F2 = 2 * fbins
        F2pad = _round_up(self.F2, 128)
        self.dft_w = jnp.pad(dft, ((0, 0), (0, F2pad - self.F2)))

        # Conv stack config (mirrors the PyTorch __init__).
        spec_channels = 2 * in_channels
        cfgs = [dict(cin=spec_channels,
                     cout=min(filters_scale * filters, max_filters),
                     ks=tuple(kernel_size), stride=(1, 1), dil=(1, 1),
                     pad=_pad2d(kernel_size))]
        in_chs = min(filters_scale * filters, max_filters)
        for i, d in enumerate(dilations):
            out_chs = min(filters_scale ** (i + 1) * filters, max_filters)
            cfgs.append(dict(cin=in_chs, cout=out_chs, ks=tuple(kernel_size),
                             stride=tuple(stride), dil=(d, 1),
                             pad=_pad2d(kernel_size, (d, 1))))
            in_chs = out_chs
        out_chs = min(filters_scale ** (len(dilations) + 1) * filters, max_filters)
        cfgs.append(dict(cin=in_chs, cout=out_chs,
                         ks=(kernel_size[0], kernel_size[0]), stride=(1, 1),
                         dil=(1, 1), pad=_pad2d((kernel_size[0], kernel_size[0]))))
        post_cfg = dict(cin=out_chs, cout=out_channels,
                        ks=(kernel_size[0], kernel_size[0]), stride=(1, 1),
                        dil=(1, 1), pad=_pad2d((kernel_size[0], kernel_size[0])))

        # Deterministic synthetic parameters (weight_norm at init == plain conv).
        if key is None:
            key = jax.random.PRNGKey(0)

        def init(k, c):
            kw_, kb_ = jax.random.split(k)
            w = 0.1 * jax.random.normal(
                kw_, (c['ks'][0], c['ks'][1], c['cin'], c['cout']), jnp.float32)
            b = 0.01 * jax.random.normal(kb_, (c['cout'],), jnp.float32)
            return w, b

        keys = jax.random.split(key, len(cfgs) + 1)
        self.convs = [(init(keys[i], c), c) for i, c in enumerate(cfgs)]
        self.conv_post = (init(keys[-1], post_cfg), post_cfg)

    def _apply_conv(self, z, w, b, c, apply_act):
        KH, KW = c['ks']
        cin = c['cin']
        if cin * KH * KW <= 512 and (KH > 1 or KW > 1):
            # Small K (tiny Cin / small-filters configs, incl. strided layers):
            # im2col so the MXU sees one K = KH*KW*Cin contraction instead of
            # KH*KW tiny K=Cin matmuls.
            zc = _im2col(z, KH, KW, c['dil'], c['pad'], c['stride'])
            w2 = w.reshape(1, 1, KH * KW * cin, c['cout'])
            return conv2d_lrelu(zc, w2, b, stride=(1, 1), dilation=(1, 1),
                                padding=(0, 0), apply_act=apply_act,
                                compute_dtype=self.compute_dtype)
        return conv2d_lrelu(z, w, b, stride=c['stride'], dilation=c['dil'],
                            padding=c['pad'], apply_act=apply_act,
                            compute_dtype=self.compute_dtype)

    def __call__(self, x):
        # x: [B, 1, Time]
        B = x.shape[0]
        xw = x.reshape(B, -1).astype(jnp.float32)

        spec = stft_pallas(xw, self.dft_w, self.n_fft, self.hop)   # [B, T, F2pad]
        T = spec.shape[1]
        # interleaved real/imag -> NHWC [B, T, F, 2] directly (ch0=real, ch1=imag);
        # matches torch cat([real, imag], dim=1) + rearrange 'b c w t -> b c t w'.
        z = spec[:, :, :self.F2].reshape(B, T, self.fbins, 2)

        fmap = []
        for (w, b), c in self.convs:
            z = self._apply_conv(z, w, b, c, apply_act=True)
            # NCHW transpose kept only for parity with the PyTorch reference; a
            # fused consumer should take the NHWC tensor directly.
            fmap.append(jnp.transpose(z, (0, 3, 1, 2)))            # [B, C, T, F]
        (w, b), c = self.conv_post
        z = self._apply_conv(z, w, b, c, apply_act=False)
        return jnp.transpose(z, (0, 3, 1, 2)), fmap


if __name__ == "__main__":
    key = jax.random.PRNGKey(0)
    # Small configuration consistent with the module's structure; filters=32
    # exercises both the im2col path and the phase-split strided-conv path.
    n_fft, hop, win = 64, 16, 64
    disc = DiscriminatorSTFTPallas(filters=32, n_fft=n_fft, hop_length=hop,
                                   win_length=win, key=key)
    B, time = 2, n_fft + hop * 7          # -> 8 STFT frames, 33 freq bins
    x = jax.random.normal(jax.random.fold_in(key, 123), (B, 1, time), jnp.float32)

    z, fmap = disc(x)
    jax.block_until_ready(z)
    for fm in fmap:
        jax.block_until_ready(fm)
    print("KERNEL_OK")
</pallas_src>

<mosaic_0001>
module attributes {stable_mosaic.version = 11 : i64} {
  func.func @kernel(%arg0: i32, %arg1: i32, %arg2: memref<1x1x11x16xf32, #tpu.memory_space<vmem>>, %arg3: memref<64x128xf32, #tpu.memory_space<vmem>>, %arg4: memref<1x8x128xf32, #tpu.memory_space<vmem>>) attributes {dimension_semantics = [#tpu.dimension_semantics<parallel>, #tpu.dimension_semantics<parallel>], iteration_bounds = array<i64: 2, 1>, scalar_prefetch = 0 : i64, scratch_operands = 0 : i64, tpu.core_type = #tpu.core_type<tc>, window_params = [{transform_indices = @transform_0, window_bounds = array<i64: 1, 1, 11, 16>}, {pipeline_mode = #tpu.pipeline_mode<synchronous>, transform_indices = @transform_1, window_bounds = array<i64: 64, 128>}, {transform_indices = @transform_2, window_bounds = array<i64: 1, 8, 128>}]} {
    %cst = arith.constant 0.000000e+00 : f32
    %0 = vector.broadcast %cst : f32 to vector<8x128xf32>
    %c0 = arith.constant 0 : index
    %c0_0 = arith.constant 0 : index
    %c0_1 = arith.constant 0 : index
    %c0_2 = arith.constant 0 : index
    %1 = vector.load %arg2[%c0, %c0_0, %c0_1, %c0_2] : memref<1x1x11x16xf32, #tpu.memory_space<vmem>>, vector<1x1x8x16xf32>
    %2 = vector.shape_cast %1 : vector<1x1x8x16xf32> to vector<8x16xf32>
    %c0_3 = arith.constant 0 : index
    %c0_4 = arith.constant 0 : index
    %3 = vector.load %arg3[%c0_3, %c0_4] : memref<64x128xf32, #tpu.memory_space<vmem>>, vector<16x128xf32>
    %cst_5 = arith.constant dense<0.000000e+00> : vector<8x128xf32>
    %4 = tpu.matmul %2, %3, %cst_5 {dimension_numbers = #tpu.dot_dimension_numbers<[1], [0], [0], [1], [0, 0, 1, 1], [], []>} : vector<8x16xf32>, vector<16x128xf32>, vector<8x128xf32> -> vector<8x128xf32>
    %5 = arith.addf %0, %4 : vector<8x128xf32>
    %c0_6 = arith.constant 0 : index
    %c0_7 = arith.constant 0 : index
    %c1 = arith.constant 1 : index
    %c0_8 = arith.constant 0 : index
    %6 = vector.load %arg2[%c0_6, %c0_7, %c1, %c0_8] : memref<1x1x11x16xf32, #tpu.memory_space<vmem>>, vector<1x1x8x16xf32>
    %7 = vector.shape_cast %6 : vector<1x1x8x16xf32> to vector<8x16xf32>
    %c16 = arith.constant 16 : index
    %c0_9 = arith.constant 0 : index
    %8 = vector.load %arg3[%c16, %c0_9] : memref<64x128xf32, #tpu.memory_space<vmem>>, vector<16x128xf32>
    %cst_10 = arith.constant dense<0.000000e+00> : vector<8x128xf32>
    %9 = tpu.matmul %7, %8, %cst_10 {dimension_numbers = #tpu.dot_dimension_numbers<[1], [0], [0], [1], [0, 0, 1, 1], [], []>} : vector<8x16xf32>, vector<16x128xf32>, vector<8x128xf32> -> vector<8x128xf32>
    %10 = arith.addf %5, %9 : vector<8x128xf32>
    %c0_11 = arith.constant 0 : index
    %c0_12 = arith.constant 0 : index
    %c2 = arith.constant 2 : index
    %c0_13 = arith.constant 0 : index
    %11 = vector.load %arg2[%c0_11, %c0_12, %c2, %c0_13] : memref<1x1x11x16xf32, #tpu.memory_space<vmem>>, vector<1x1x8x16xf32>
    %12 = vector.shape_cast %11 : vector<1x1x8x16xf32> to vector<8x16xf32>
    %c32 = arith.constant 32 : index
    %c0_14 = arith.constant 0 : index
    %13 = vector.load %arg3[%c32, %c0_14] : memref<64x128xf32, #tpu.memory_space<vmem>>, vector<16x128xf32>
    %cst_15 = arith.constant dense<0.000000e+00> : vector<8x128xf32>
    %14 = tpu.matmul %12, %13, %cst_15 {dimension_numbers = #tpu.dot_dimension_numbers<[1], [0], [0], [1], [0, 0, 1, 1], [], []>} : vector<8x16xf32>, vector<16x128xf32>, vector<8x128xf32> -> vector<8x128xf32>
    %15 = arith.addf %10, %14 : vector<8x128xf32>
    %c0_16 = arith.constant 0 : index
    %c0_17 = arith.constant 0 : index
    %c3 = arith.constant 3 : index
    %c0_18 = arith.constant 0 : index
    %16 = vector.load %arg2[%c0_16, %c0_17, %c3, %c0_18] : memref<1x1x11x16xf32, #tpu.memory_space<vmem>>, vector<1x1x8x16xf32>
    %17 = vector.shape_cast %16 : vector<1x1x8x16xf32> to vector<8x16xf32>
    %c48 = arith.constant 48 : index
    %c0_19 = arith.constant 0 : index
    %18 = vector.load %arg3[%c48, %c0_19] : memref<64x128xf32, #tpu.memory_space<vmem>>, vector<16x128xf32>
    %cst_20 = arith.constant dense<0.000000e+00> : vector<8x128xf32>
    %19 = tpu.matmul %17, %18, %cst_20 {dimension_numbers = #tpu.dot_dimension_numbers<[1], [0], [0], [1], [0, 0, 1, 1], [], []>} : vector<8x16xf32>, vector<16x128xf32>, vector<8x128xf32> -> vector<8x128xf32>
    %20 = arith.addf %15, %19 : vector<8x128xf32>
    %c0_21 = arith.constant 0 : index
    %c0_22 = arith.constant 0 : index
    %c0_23 = arith.constant 0 : index
    %21 = vector.load %arg4[%c0_21, %c0_22, %c0_23] : memref<1x8x128xf32, #tpu.memory_space<vmem>>, vector<1x8x128xf32>
    %22 = vector.shape_cast %21 : vector<1x8x128xf32> to vector<8x128xf32>
    %23 = vector.shape_cast %20 : vector<8x128xf32> to vector<1x8x128xf32>
    tpu.vector_store %arg4[%c0_21, %c0_22, %c0_23], %23 {strides = array<i32>} : memref<1x8x128xf32, #tpu.memory_space<vmem>>, vector<1x8x128xf32>,
    return
  }
  func.func @transform_0(%arg0: i32, %arg1: i32) -> (i32, i32, i32, i32) {
    %c0_i32 = arith.constant 0 : i32
    %c0_i32_0 = arith.constant 0 : i32
    %c0_i32_1 = arith.constant 0 : i32
    return %arg0, %arg1, %c0_i32, %c0_i32_0 : i32, i32, i32, i32
  }
  func.func @transform_1(%arg0: i32, %arg1: i32) -> (i32, i32) {
    %c0_i32 = arith.constant 0 : i32
    %c0_i32_0 = arith.constant 0 : i32
    %c0_i32_1 = arith.constant 0 : i32
    return %c0_i32, %c0_i32_0 : i32, i32
  }
  func.func @transform_2(%arg0: i32, %arg1: i32) -> (i32, i32, i32) {
    %c0_i32 = arith.constant 0 : i32
    %c0_i32_0 = arith.constant 0 : i32
    return %arg0, %arg1, %c0_i32 : i32, i32, i32
  }
}

</mosaic_0001>

<bundles_post_ra>
// kernel: tpu_custom_call.1
= control target key start
LH: loop header
LB: loop body
LE: loop exit
PB: predicated region body
PF: predicated region fallthrough
CT: control target
= control target key end

     0   :  { %7 = vsyncpa [#allocation3], 0  ;;  %s724_s0 = inlined_call_operand.vmem [shape: f32[2,1,11,16], index: 0, kind: input, shape index: {}]   ;;  %s725_s1 = inlined_call_operand.hbm [shape: f32[64,128], index: 1, kind: input, shape index: {}]   ;;  %s726_s2 = inlined_call_operand.hbm [shape: f32[2,8,128], index: 2, kind: output, shape index: {}]  }
   0x1   :  { %8 = vsyncpa [#allocation4], 0 }
   0x2   :  { %10 = vsyncpa [#allocation4 + $0x1], 0  ;;  %s620_s9 = smov 0   ;;  %s622_s10 = smov 0  }
   0x3   :  { %s624_s11 = smov 0   ;;  %s626_s12 = smov 0  }
   0x4   :  { %s628_s13 = smov 0   ;;  %s630_s14 = smov 0  }
   0x5 LB: > { %s401_s15 = sadd.s32 4294967295, %s600_s14   ;;  %s402_s16 = sadd.s32 4294967294, %s600_s14   ;;  %s600_s14 = sphi %s630_s14, %s16_s14   ;;  %s596_s13 = sphi %s628_s13, %s733_s13   ;;  %s592_s12 = sphi %s626_s12, %s732_s12   ;;  %s588_s11 = sphi %s624_s11, %s731_s11   ;;  %s584_s10 = sphi %s622_s10, %s730_s10   ;;  %s580_s9 = sphi %s620_s9, %s729_s9  }
   0x6   : > { %s28_s17 = sadd.s32 1, %s596_s13  ;;  %s86_s18 = sadd.s32 1, %s588_s11 }
   0x7   : > { %p30_p0 = scmp.ge.s32.totalorder %s28_s17, 2  ;;  %p96_p1 = scmp.ne.s32.totalorder %s588_s11, %s584_s10 }
   0x8   : > { %p97_p2 = scmp.eq.s32.totalorder %s401_s15, 1  ;;  %p102_p3 = scmp.ne.s32.totalorder %s584_s10, %s580_s9 }
   0x9   : > { %s735_s17 = smov (%p30_p0, %s28_s17), 0  ;;  %p103_p5 = scmp.eq.s32.totalorder %s402_s16, 1 }
   0xa   : > { %p660_p4 = por %p97_p2, %p96_p1  ;;  %s81_s20 = ssub.s32 %s596_s13, %s735_s17 }
   0xb   : > { %p403_p6 = scmp.ge.s32.totalorder %s600_s14, 1  ;;  %p84_p7 = scmp.eq.s32.totalorder %s81_s20, 0 }
   0xc   : > { %p667_p8 = por %p103_p5, %p102_p3  ;;  %p110_p9 = scmp.lt.s32.totalorder %s600_s14, 3 }
   0xd   : > { %s673_s22 = scalar_select %p84_p7, %s588_s11, %s86_s18  }
   0xe   : > { %p111_p10 = pnand %p403_p6, %p110_p9  ;;  %p434_p11 = scmp.eq.s32.totalorder %s401_s15, 0 }
   0xf   : > { %s121_s25 = sshll.u32 %s725_s1, 4  ;;  %s602_s26 = smov [#allocation2]   ;;  %s122_s25 = int_to_ptr.hbm [resolvable:$true] %s121_s25 }
  0x10   : > { %p426_p12 = pneg %p111_p10  ;;  %s123_s27 = sshll.u32 %s602_s26, 4  ;;  %s124_s27 = int_to_ptr.vmem [resolvable:$true] %s123_s27 }
  0x11   : > { %s603_s28 = smov 128   ;;  %s604_s29 = smov 8  }
  0x12   : > { %p427_p13 = pnand %p434_p11, %p426_p12  ;;  %151 = sbr.rel (%p111_p10) target bundleno = 170 (0xaa), region = 28 }
  0x14   : > { %429 = dma.hbm_to_vmem [thread:$0]  (!%p427_p13), %s122_s25, 1024, %s124_s27, [#allocation3], %s603_s28, %s603_s28, %s604_s29  }
  0x17   : > { %571 = dma.done.wait (%p434_p11), [#allocation3], 1024  }
  0x18   : > { %573 = vsyncadd (%p434_p11), [#allocation3], 4294966272  ;;  %p178_p0 = scmp.lt.s32.totalorder %s592_s12, 1  ;;  %v242_v0 = vld [vmem:[#allocation2 + $0x28] sm:$0xff]  ;;  %v241_v1 = vld [vmem:[#allocation2 + $0x20] sm:$0xff]  ;;  %vm193_vm0 = vcmask 130048  }
  0x19   : > { %v269_v2 = vld [vmem:[#allocation2 + $0x38] sm:$0xff]  ;;  %260 = vmatpush.msra.mxu2 %v242_v0  ;;  %v189_v5 = vld [vmem:[#allocation2 + $0x8] sm:$0xff]  ;;  %v268_v6 = vld [vmem:[#allocation2 + $0x30] sm:$0xff]  ;;  %s175_s7 = sand.u32 1, %s584_s10   ;;  %s416_s15 = sshll.u32 %s592_s12, 3 }
  0x1a   : > { %s179_s30 = scalar_select %p178_p0, %s592_s12, 1  ;;  %287 = vmatpush.msra.mxu3 %v269_v2  ;;  %v192_v4 = vld [vmem:[#allocation2 + $0x18] sm:$0xff]  ;;  %234 = vmatpush.msra.mxu1 %v189_v5  ;;  %v191_v8 = vld [vmem:[#allocation2 + $0x10] sm:$0xff]  ;;  %v188_v9 = vld [vmem:[#allocation2] sm:$0xff] }
  0x1b   : > { %211 = vmatpush.msra.mxu0 %v192_v4  ;;  %261 = vmatpush.msra.mxu2 %v241_v1  ;;  %s408_s8 = sshll.u32 %s175_s7, 3  ;;  %s307_s20 = scalar_lea.hbm %s726_s2, %s416_s15 }
  0x1c   : > { %s419_s3 = sshll.u32 %s179_s30, 4  ;;  %288 = vmatpush.msra.mxu3 %v268_v6  ;;  %235 = vmatpush.msra.mxu1 %v188_v9  ;;  %s177_s23 = scalar_lea.vmem [#allocation5], %s408_s8 }
  0x1d   : > { %s186_s6 = scalar_lea.vmem %s724_s0, %s419_s3  ;;  %212 = vmatpush.msra.mxu0 %v191_v8  ;;  %s309_s24 = sshll.u32 %s177_s23, 4  ;;  %s310_s24 = int_to_ptr.vmem [resolvable:$true] %s309_s24 }
  0x1e   : > { %v240_v3 = vld [vmem:[%s186_s6 + $0x2] sm:$0xff]  ;;  %s311_s25 = sshll.u32 %s307_s20, 4  ;;  %s296_s26 = scalar_lea.sflag [#allocation4], %s175_s7  ;;  %s312_s25 = int_to_ptr.hbm [resolvable:$true] %s311_s25 }
  0x1f   : > { %v267_v7 = vld [vmem:[%s186_s6 + $0x3] sm:$0xff]  ;;  %413 = vmatmul.msk.f32.vlgmr.msra.gmra.mxu2 %vm193_vm0, %v240_v3  ;;  %s532_s12 = sshra.s32 %s312_s25, 4  ;;  %s538_s30 = scalar_lea.hbm %s726_s2, 16  ;;  %s533_s12 = int_to_ptr.hbm [resolvable:$true] %s532_s12 }
  0x20   : > { %v190_v10 = vld [vmem:[%s186_s6 + $0x1] sm:$0xff]  ;;  %414 = vmatmul.msk.f32.vlgmr.msra.gmra.mxu3 %vm193_vm0, %v267_v7  ;;  %s534_s27 = scalar_lea.hbm %s533_s12, 8  ;;  %p539_p5 = scmp.lt.s32.totalorder %s533_s12, %s726_s2 }
  0x21   : > { %v187_v11 = vld [vmem:[%s186_s6] sm:$0xff]  ;;  %411 = vmatmul.msk.f32.vlgmr.msra.gmra.mxu0 %vm193_vm0, %v190_v10  ;;  %p535_p1 = scmp.ne.s32.totalorder %s533_s12, %s534_s27  ;;  %p540_p6 = scmp.lt.s32.totalorder %s538_s30, %s534_s27 }
  0x22   : > { %412 = vmatmul.msk.f32.vlgmr.msra.gmra.mxu1 %vm193_vm0, %v187_v11 }
  0x23   : > { %p536_p2 = pnand %p535_p1, %p660_p4  ;;  %p541_p7 = por %p540_p6, %p539_p5 }
  0x25   : > { %p537_p3 = pneg %p536_p2 }
  0x27   : > { %p542_p9 = pnand %p541_p7, %p537_p3 }
  0x9e   : > { %v214_v12 = vpop.f32.mrf.mxu0 }
  0x9f   : > { %v237_v13 = vpop.f32.mrf.mxu1 }
  0xa0   : > { %v238_v14 = vadd.f32 %v237_v13, %v214_v12 }
  0xa2   : > { %v263_v15 = vpop.f32.mrf.mxu2 }
  0xa3   : > { %v290_v16 = vpop.f32.mrf.mxu3  ;;  %v266_v17 = vadd.f32 %v263_v15, %v238_v14 }
  0xa5   : > { %v293_v18 = vadd.f32 %v290_v16, %v266_v17 }
  0xa7   : > { %294 = vst [vmem:[%s177_s23] sm:$0xff] %v293_v18 }
  0xa8   : > { %545 = shalt.err (!%p542_p9)
}
  0xa9   : > { %424 = dma.vmem_to_hbm [thread:$0]  (%p660_p4), %s310_s24, 128, %s312_s25, %s296_s26  }
  0xaa PF: > { %p436_p10 = scmp.ge.s32.totalorder %s600_s14, 2  ;;  %s323_s5 = sand.u32 1, %s580_s9  }
  0xab   : > { %s324_s6 = scalar_lea.sflag [#allocation4], %s323_s5 }
  0xac   : > { %p431_p11 = pnand %p436_p10, %p667_p8 }
  0xae   : > { %p432_p12 = pneg %p431_p11 }
  0xb0   : > { %575 = dma.done.wait (%p432_p12), %s324_s6, 128  }
  0xb1   : > { %577 = vsyncadd (%p432_p12), %s324_s6, 4294967168  ;;  %s16_s14 = sadd.s32 1, %s600_s14   ;;  %s729_s9 = smov %s584_s10 }
  0xb2   : > { %p13_p13 = scmp.ge.s32.totalorder %s16_s14, 4   ;;  %s730_s10 = smov %s588_s11 }
  0xb3   : > { %s731_s11 = smov %s673_s22  ;;  %s732_s12 = smov %s596_s13 }
  0xb4   : > { %s733_s13 = smov %s735_s17  ;;  %15 = sbr.rel (!%p13_p13) target bundleno = 5 (0x5), region = 68 }
  0xb9   :  { %330 = vsyncpa [#allocation3], 1 }
  0xba   :  { %332 = vsyncpa [#allocation3 + $0x1], 1 }
  0xbb   :  { %333 = vsyncpa [#allocation4], 1 }
  0xbc   :  { %335 = vsyncpa [#allocation4 + $0x1], 1 }

</bundles_post_ra>
